<compile_context>
chip_gen: v7x
topology: tpu7x:2x2x1
jax: 0.10.0
libtpu: 0.0.40
codegen_flags: <defaults>
</compile_context>

<pallas_src>
import jax
import jax.numpy as jnp
from jax.experimental import pallas as pl
from jax.experimental.pallas import tpu as pltpu

GAMMA = 2.0        # FocalLoss gamma used by set_loss('focal'); realized as the explicit square below.
_CHUNK = 2048      # in-kernel scan chunk width (lanes) for the Lovasz kernel
_TILE_CANDIDATES = (262144, 131072, 65536, 32768, 16384, 8192, 4096,
                    2048, 1024, 512, 256, 128)


def _vmem_capacity_bytes():
    """Physical VMEM of the current TPU generation (fallback: 64 MiB, safe everywhere)."""
    try:
        cap = int(pltpu.get_tpu_info().vmem_capacity_bytes)
        if cap > 0:
            return cap
    except Exception:
        pass
    return 64 * 1024 * 1024


def _pick_tile(n, bytes_per_px, budget, cap):
    """Largest lane-aligned tile dividing n whose double-buffered working set fits `budget`."""
    for t in _TILE_CANDIDATES:
        if t <= cap and n % t == 0 and 2 * t * bytes_per_px <= budget:
            return t
    return n


def _prep_kernel(logits_ref, labels_ref, key_ref, focal_ref, gts_ref):
    """One (image, pixel-tile) grid step.

    logits_ref: (1, C, TP) logits (native dtype, cast in-kernel)
    labels_ref: (1, 1, TP) i32 labels
    key_ref:    (C, TP) f32 packed sort key: -(|onehot - probs|) with the
                foreground bit (onehot) stored in the mantissa LSB.
    focal_ref:  (1, 1, 1) per-image focal-sum accumulator (resident across the pixel axis)
    gts_ref:    (1, C, 1) per-image per-class foreground-count accumulator
    """
    @pl.when(pl.program_id(1) == 0)
    def _init():
        focal_ref[...] = jnp.zeros_like(focal_ref)
        gts_ref[...] = jnp.zeros_like(gts_ref)

    x = logits_ref[0].astype(jnp.float32)      # (C, TP)
    lab = labels_ref[0]                        # (1, TP) i32

    class_ids = jax.lax.broadcasted_iota(jnp.int32, x.shape, 0)
    is_true = lab == class_ids                 # (C, TP) bool
    onehot = is_true.astype(jnp.float32)

    # ---- Focal (smp multiclass): per-class sigmoid BCE * (1-pt)^2, summed over
    # classes and pixels; divided by the pixel count in the glue.
    # One exp + one log per element: pt is recovered from e = exp(-|x|) with selects.
    e = jnp.exp(-jnp.abs(x))
    logpt = jnp.maximum(x, 0.0) - x * onehot + jnp.log(1.0 + e)
    agree = (x >= 0.0) == is_true
    pt = jnp.where(agree, 1.0, e) / (1.0 + e)              # == exp(-logpt), exactly
    one_minus_pt = 1.0 - pt
    focal_elem = one_minus_pt * one_minus_pt * logpt       # gamma == 2
    focal_ref[...] += jnp.sum(focal_elem, keepdims=True)[None]

    # ---- Lovasz prep: softmax over classes (sublane axis), packed sort key, fg totals.
    m = jnp.max(x, axis=0, keepdims=True)
    ex = jnp.exp(x - m)
    inv = 1.0 / jnp.sum(ex, axis=0, keepdims=True)         # 1 divide per pixel, C multiplies
    probs = ex * inv
    neg_err = -jnp.abs(onehot - probs)                     # negated -> ascending sort == descending err
    bits = pltpu.bitcast(neg_err, jnp.uint32)
    packed = (bits & jnp.uint32(0xFFFFFFFE)) | is_true.astype(jnp.uint32)
    key_ref[...] = pltpu.bitcast(packed, jnp.float32)      # LSB perturbation <= 2^-23 relative
    gts_ref[...] += jnp.sum(onehot, axis=1, keepdims=True)[None]


def _cumsum_lanes(x, lane):
    """Inclusive prefix-sum along the lane (last) axis: log2(width) roll-and-add."""
    width = x.shape[-1]
    y = x
    shift = 1
    while shift < width:
        rolled = pltpu.roll(y, shift, axis=1)              # rolled[:, l] = y[:, l - shift]
        y = y + jnp.where(lane >= shift, rolled, 0.0)      # mask the wrap-around
        shift *= 2
    return y


def _lovasz_kernel(key_ref, gts_ref, out_ref, cum_ref, jac_ref, acc_ref):
    """One pixel-tile step of Lovasz-softmax over the pre-sorted packed keys.

    key_ref: (C, T) sorted packed keys (-err with fg in the LSB); gts_ref: (C, 1) fg totals.
    Scratch carries: cum_ref (C,1) running cumsum(fg); jac_ref (C,1) jaccard at the
    end of the previous chunk; acc_ref (C,1) running per-class dot(err, grad).
    The tile is scanned in _CHUNK-lane sub-chunks to bound XLU roll work.
    """
    t_idx = pl.program_id(0)

    @pl.when(t_idx == 0)
    def _init():
        cum_ref[...] = jnp.zeros_like(cum_ref)
        jac_ref[...] = jnp.zeros_like(jac_ref)
        acc_ref[...] = jnp.zeros_like(acc_ref)

    gts = gts_ref[...]                                     # (C, 1)
    c, tile = key_ref.shape
    cs = _CHUNK if (tile % _CHUNK == 0) else tile
    n_sub = tile // cs
    base = t_idx * tile                                    # global pixel offset of this tile

    lane = jax.lax.broadcasted_iota(jnp.int32, (c, cs), 1)  # hoisted out of the chunk loop

    for s in range(n_sub):                                 # static chunk loop (bounded unroll)
        off = s * cs
        key = key_ref[:, off:off + cs]                     # (C, cs) packed: -err, fg in LSB
        bits = pltpu.bitcast(key, jnp.uint32)
        fg = (bits & jnp.uint32(1)).astype(jnp.float32)

        cum0 = cum_ref[...]
        cum_fg = _cumsum_lanes(fg, lane) + cum0            # global inclusive cumsum(fg)
        pos = (base + off + lane + 1).astype(jnp.float32)  # 1-based global rank
        inter = gts - cum_fg
        union = gts + pos - cum_fg                         # cumsum(1-fg) == pos - cumsum(fg); >= 1
        jac = 1.0 - inter / union

        # First difference (Lovasz gradient) with a carry across chunk/tile boundaries.
        prev = pltpu.roll(jac, 1, axis=1)
        prev = jnp.where(lane == 0, jac_ref[...], prev)    # jac_ref broadcasts over lanes
        grad = jac - prev
        acc_ref[...] -= jnp.sum(key * grad, axis=1, keepdims=True)   # err == -key

        # Update carries for the next chunk / tile.
        new_cum = cum0 + jnp.sum(fg, axis=1, keepdims=True)
        cum_ref[...] = new_cum
        pos_last = (base + off + cs).astype(jnp.float32)
        jac_ref[...] = 1.0 - (gts - new_cum) / (gts + pos_last - new_cum)

    @pl.when(t_idx == pl.num_programs(0) - 1)
    def _final():
        present = (gts > 0.0).astype(jnp.float32)
        num = jnp.sum(acc_ref[...] * present, keepdims=True)
        den = jnp.maximum(jnp.sum(present, keepdims=True), 1.0)
        out_ref[...] = num / den


def combined_focal_lovasz_loss(y_pred, y_true):
    """y_pred: (N, C, H, W) float logits; y_true: (N, H, W) int labels."""
    N, C, H, W = y_pred.shape
    HW = H * W
    P = N * HW

    # Lane-dense layout end-to-end; no wrapper-side dtype materialization of the
    # logits (the per-tile cast happens in-kernel, for free on the VPU).
    logits = y_pred.reshape(N, C, HW)
    labels = y_true.reshape(N, 1, HW)
    if labels.dtype != jnp.int32:
        labels = labels.astype(jnp.int32)

    vmem_cap = _vmem_capacity_bytes()                     # 64 MiB (v7x) .. 128 MiB (v5e/v6e)
    vmem_limit = min(int(vmem_cap * 0.8), 112 * 1024 * 1024)
    tile_budget = int(vmem_cap * 0.55)                    # cap on the double-buffered working set

    in_bytes = jnp.dtype(logits.dtype).itemsize
    prep_bpp = C * in_bytes + 4 + C * 4                   # logits + labels + key bytes per pixel
    tp = _pick_tile(HW, prep_bpp, tile_budget, cap=262144)
    n_h = HW // tp

    key, focal_parts, gts_parts = pl.pallas_call(
        _prep_kernel,
        grid=(N, n_h),
        in_specs=[
            pl.BlockSpec((1, C, tp), lambda n, h: (n, 0, h)),
            pl.BlockSpec((1, 1, tp), lambda n, h: (n, 0, h)),
        ],
        out_specs=(
            pl.BlockSpec((C, tp), lambda n, h: (0, n * n_h + h)),
            pl.BlockSpec((1, 1, 1), lambda n, h: (n, 0, 0)),
            pl.BlockSpec((1, C, 1), lambda n, h: (n, 0, 0)),
        ),
        out_shape=(
            jax.ShapeDtypeStruct((C, P), jnp.float32),
            jax.ShapeDtypeStruct((N, 1, 1), jnp.float32),
            jax.ShapeDtypeStruct((N, C, 1), jnp.float32),
        ),
        compiler_params=pltpu.CompilerParams(
            dimension_semantics=("parallel", "arbitrary"),   # batch axis across v7x TensorCores
            vmem_limit_bytes=vmem_limit,
        ),
    )(logits, labels)

    focal = jnp.sum(focal_parts) / jnp.float32(P)
    gts = jnp.sum(gts_parts, axis=0)                      # (C, 1) per-class foreground counts

    # TODO(synk): torch.sort(errors, descending=True) has no Pallas/TPU sort
    # primitive; the per-class sort is one XLA lax.sort of the packed key
    # (ascending sort of -err == descending sort of err, fg rides in the LSB).
    key_s = jax.lax.sort(key, dimension=1)

    t = _pick_tile(P, C * 4, tile_budget, cap=32768)
    n_t = P // t

    lovasz = pl.pallas_call(
        _lovasz_kernel,
        grid=(n_t,),
        in_specs=[
            pl.BlockSpec((C, t), lambda i: (0, i)),
            pl.BlockSpec((C, 1), lambda i: (0, 0)),
        ],
        out_specs=pl.BlockSpec((1, 1), lambda i: (0, 0)),
        out_shape=jax.ShapeDtypeStruct((1, 1), jnp.float32),
        scratch_shapes=[
            pltpu.VMEM((C, 1), jnp.float32),   # running cumsum(fg)
            pltpu.VMEM((C, 1), jnp.float32),   # jaccard carry at chunk/tile boundary
            pltpu.VMEM((C, 1), jnp.float32),   # per-class running dot(err, grad)
        ],
        compiler_params=pltpu.CompilerParams(
            dimension_semantics=("arbitrary",),
            vmem_limit_bytes=vmem_limit,
        ),
    )(key_s, gts)

    return focal + lovasz[0, 0]


def _reference(y_pred, y_true):
    """Pure-JAX reference matching the PyTorch (smp) semantics."""
    N, C, H, W = y_pred.shape
    P = N * H * W
    logits = jnp.transpose(y_pred, (0, 2, 3, 1)).reshape(P, C).astype(jnp.float32)
    onehot = jax.nn.one_hot(y_true.reshape(P), C, dtype=jnp.float32)
    # focal
    logpt = jnp.maximum(logits, 0.0) - logits * onehot + jnp.log(1.0 + jnp.exp(-jnp.abs(logits)))
    pt = jnp.exp(-logpt)
    focal = jnp.sum((1.0 - pt) * (1.0 - pt) * logpt) / P
    # lovasz softmax
    probs = jax.nn.softmax(logits, axis=1)
    err = jnp.abs(onehot - probs)
    order = jnp.argsort(-err, axis=0)
    err_s = jnp.take_along_axis(err, order, axis=0)
    fg_s = jnp.take_along_axis(onehot, order, axis=0)
    gts = jnp.sum(fg_s, axis=0)
    inter = gts - jnp.cumsum(fg_s, axis=0)
    union = gts + jnp.cumsum(1.0 - fg_s, axis=0)
    jac = 1.0 - inter / union
    grad = jnp.concatenate([jac[:1], jac[1:] - jac[:-1]], axis=0)
    per_class = jnp.sum(err_s * grad, axis=0)
    present = gts > 0
    lovasz = jnp.sum(jnp.where(present, per_class, 0.0)) / jnp.sum(present)
    return focal + lovasz


if __name__ == "__main__":
    key = jax.random.PRNGKey(0)
    k1, k2 = jax.random.split(key)
    N, C, H, W = 2, 4, 16, 16
    y_pred = jax.random.normal(k1, (N, C, H, W), dtype=jnp.float32)
    y_true = jax.random.randint(k2, (N, H, W), 0, C, dtype=jnp.int32)

    out = combined_focal_lovasz_loss(y_pred, y_true)
    out = jax.block_until_ready(out)

    ref = jax.block_until_ready(_reference(y_pred, y_true))
    assert jnp.allclose(out, ref, rtol=2e-4, atol=2e-4), (out, ref)
    print("KERNEL_OK")
</pallas_src>

<mosaic_0001>
module attributes {stable_mosaic.version = 11 : i64} {
  func.func @_prep_kernel(%arg0: i32, %arg1: i32, %arg2: memref<1x4x256xf32, #tpu.memory_space<vmem>>, %arg3: memref<1x1x256xi32, #tpu.memory_space<vmem>>, %arg4: memref<4x256xf32, #tpu.memory_space<vmem>>, %arg5: memref<1x1x1xf32, #tpu.memory_space<vmem>>, %arg6: memref<1x4x1xf32, #tpu.memory_space<vmem>>) attributes {dimension_semantics = [#tpu.dimension_semantics<parallel>, #tpu.dimension_semantics<arbitrary>], iteration_bounds = array<i64: 2, 1>, scalar_prefetch = 0 : i64, scratch_operands = 0 : i64, tpu.core_type = #tpu.core_type<tc>, window_params = [{transform_indices = @transform_0, window_bounds = array<i64: 1, 4, 256>}, {transform_indices = @transform_1, window_bounds = array<i64: 1, 1, 256>}, {transform_indices = @transform_2, window_bounds = array<i64: 4, 256>}, {transform_indices = @transform_3, window_bounds = array<i64: 1, 1, 1>}, {transform_indices = @transform_4, window_bounds = array<i64: 1, 4, 1>}]} {
    %c0_i32 = arith.constant 0 : i32
    %0 = arith.cmpi eq, %arg1, %c0_i32 : i32
    %1 = arith.extui %0 : i1 to i32
    %c0_i32_0 = arith.constant 0 : i32
    %2 = arith.cmpi ne, %1, %c0_i32_0 : i32
    scf.if %2 {
      %cst_33 = arith.constant 0.000000e+00 : f32
      %74 = vector.broadcast %cst_33 : f32 to vector<1x1x1xf32>
      %c0_34 = arith.constant 0 : index
      %c0_35 = arith.constant 0 : index
      %c0_36 = arith.constant 0 : index
      %75 = vector.load %arg5[%c0_34, %c0_35, %c0_36] : memref<1x1x1xf32, #tpu.memory_space<vmem>>, vector<1x1x1xf32>
      tpu.vector_store %arg5[%c0_34, %c0_35, %c0_36], %74 {strides = array<i32>} : memref<1x1x1xf32, #tpu.memory_space<vmem>>, vector<1x1x1xf32>,
      %cst_37 = arith.constant 0.000000e+00 : f32
      %76 = vector.broadcast %cst_37 : f32 to vector<1x4x1xf32>
      %c0_38 = arith.constant 0 : index
      %c0_39 = arith.constant 0 : index
      %c0_40 = arith.constant 0 : index
      %77 = vector.load %arg6[%c0_38, %c0_39, %c0_40] : memref<1x4x1xf32, #tpu.memory_space<vmem>>, vector<1x4x1xf32>
      tpu.vector_store %arg6[%c0_38, %c0_39, %c0_40], %76 {strides = array<i32>} : memref<1x4x1xf32, #tpu.memory_space<vmem>>, vector<1x4x1xf32>,
    } else {
    }
    %c0 = arith.constant 0 : index
    %c0_1 = arith.constant 0 : index
    %c0_2 = arith.constant 0 : index
    %3 = vector.load %arg2[%c0, %c0_1, %c0_2] : memref<1x4x256xf32, #tpu.memory_space<vmem>>, vector<1x4x256xf32>
    %4 = vector.shape_cast %3 : vector<1x4x256xf32> to vector<4x256xf32>
    %c0_3 = arith.constant 0 : index
    %c0_4 = arith.constant 0 : index
    %c0_5 = arith.constant 0 : index
    %5 = vector.load %arg3[%c0_3, %c0_4, %c0_5] : memref<1x1x256xi32, #tpu.memory_space<vmem>>, vector<1x1x256xi32>
    %6 = vector.shape_cast %5 : vector<1x1x256xi32> to vector<1x256xi32>
    %7 = tpu.iota {dimensions = array<i32: 0>} : vector<4x256xi32>
    %8 = vector.broadcast %6 : vector<1x256xi32> to vector<4x256xi32>
    %9 = arith.cmpi eq, %8, %7 : vector<4x256xi32>
    %10 = arith.extui %9 : vector<4x256xi1> to vector<4x256xi32>
    %11 = arith.sitofp %10 : vector<4x256xi32> to vector<4x256xf32>
    %12 = math.absf %4 : vector<4x256xf32>
    %cst = arith.constant 0.000000e+00 : f32
    %13 = vector.broadcast %cst : f32 to vector<4x256xf32>
    %14 = arith.subf %13, %12 : vector<4x256xf32>
    %15 = math.exp %14 : vector<4x256xf32>
    %cst_6 = arith.constant 0.000000e+00 : f32
    %16 = vector.broadcast %cst_6 : f32 to vector<4x256xf32>
    %17 = arith.maximumf %4, %16 : vector<4x256xf32>
    %18 = arith.mulf %4, %11 : vector<4x256xf32>
    %19 = arith.subf %17, %18 : vector<4x256xf32>
    %cst_7 = arith.constant 1.000000e+00 : f32
    %20 = vector.broadcast %cst_7 : f32 to vector<4x256xf32>
    %21 = arith.addf %20, %15 : vector<4x256xf32>
    %22 = math.log %21 : vector<4x256xf32>
    %23 = arith.addf %19, %22 : vector<4x256xf32>
    %cst_8 = arith.constant 0.000000e+00 : f32
    %24 = vector.broadcast %cst_8 : f32 to vector<4x256xf32>
    %25 = arith.cmpf oge, %4, %24 : vector<4x256xf32>
    %26 = arith.xori %25, %9 : vector<4x256xi1>
    %cst_9 = arith.constant dense<true> : vector<4x256xi1>
    %27 = arith.xori %26, %cst_9 : vector<4x256xi1>
    %cst_10 = arith.constant 1.000000e+00 : f32
    %28 = vector.broadcast %cst_10 : f32 to vector<4x256xf32>
    %29 = arith.select %27, %28, %15 : vector<4x256xi1>, vector<4x256xf32>
    %cst_11 = arith.constant 1.000000e+00 : f32
    %30 = vector.broadcast %cst_11 : f32 to vector<4x256xf32>
    %31 = arith.addf %30, %15 : vector<4x256xf32>
    %32 = arith.divf %29, %31 : vector<4x256xf32>
    %cst_12 = arith.constant 1.000000e+00 : f32
    %33 = vector.broadcast %cst_12 : f32 to vector<4x256xf32>
    %34 = arith.subf %33, %32 : vector<4x256xf32>
    %35 = arith.mulf %34, %34 : vector<4x256xf32>
    %36 = arith.mulf %35, %23 : vector<4x256xf32>
    %c0_13 = arith.constant 0 : index
    %c0_14 = arith.constant 0 : index
    %c0_15 = arith.constant 0 : index
    %37 = vector.load %arg5[%c0_13, %c0_14, %c0_15] : memref<1x1x1xf32, #tpu.memory_space<vmem>>, vector<1x1x1xf32>
    %38 = vector.shape_cast %36 : vector<4x256xf32> to vector<1x4x256xf32>
    %cst_16 = arith.constant dense<0.000000e+00> : vector<1xf32>
    %39 = vector.multi_reduction <add>, %38, %cst_16 [1, 2] : vector<1x4x256xf32> to vector<1xf32>
    %40 = vector.shape_cast %39 : vector<1xf32> to vector<1x1x1xf32>
    %41 = vector.extract %40[0, 0, 0] : f32 from vector<1x1x1xf32>
    %42 = vector.broadcast %41 : f32 to vector<1x1xf32>
    %43 = vector.shape_cast %42 : vector<1x1xf32> to vector<1x1x1xf32>
    %44 = arith.addf %37, %43 : vector<1x1x1xf32>
    %c0_17 = arith.constant 0 : index
    %c0_18 = arith.constant 0 : index
    %c0_19 = arith.constant 0 : index
    %45 = vector.load %arg5[%c0_17, %c0_18, %c0_19] : memref<1x1x1xf32, #tpu.memory_space<vmem>>, vector<1x1x1xf32>
    tpu.vector_store %arg5[%c0_17, %c0_18, %c0_19], %44 {strides = array<i32>} : memref<1x1x1xf32, #tpu.memory_space<vmem>>, vector<1x1x1xf32>,
    %cst_20 = arith.constant dense<0xFF800000> : vector<256xf32>
    %46 = vector.multi_reduction <maximumf>, %4, %cst_20 [0] : vector<4x256xf32> to vector<256xf32>
    %47 = vector.shape_cast %46 : vector<256xf32> to vector<1x256xf32>
    %48 = vector.broadcast %47 : vector<1x256xf32> to vector<4x256xf32>
    %49 = arith.subf %4, %48 : vector<4x256xf32>
    %50 = math.exp %49 : vector<4x256xf32>
    %cst_21 = arith.constant dense<0.000000e+00> : vector<256xf32>
    %51 = vector.multi_reduction <add>, %50, %cst_21 [0] : vector<4x256xf32> to vector<256xf32>
    %52 = vector.shape_cast %51 : vector<256xf32> to vector<1x256xf32>
    %cst_22 = arith.constant 1.000000e+00 : f32
    %53 = vector.broadcast %cst_22 : f32 to vector<1x256xf32>
    %54 = arith.divf %53, %52 : vector<1x256xf32>
    %55 = vector.broadcast %54 : vector<1x256xf32> to vector<4x256xf32>
    %56 = arith.mulf %50, %55 : vector<4x256xf32>
    %57 = arith.subf %11, %56 : vector<4x256xf32>
    %58 = math.absf %57 : vector<4x256xf32>
    %cst_23 = arith.constant 0.000000e+00 : f32
    %59 = vector.broadcast %cst_23 : f32 to vector<4x256xf32>
    %60 = arith.subf %59, %58 : vector<4x256xf32>
    %61 = tpu.bitcast %60 : vector<4x256xf32> -> vector<4x256xi32>
    %c-2_i32 = arith.constant -2 : i32
    %62 = vector.broadcast %c-2_i32 : i32 to vector<4x256xi32>
    %63 = arith.andi %61, %62 : vector<4x256xi32>
    %64 = arith.extui %9 : vector<4x256xi1> to vector<4x256xi32>
    %65 = arith.ori %63, %64 : vector<4x256xi32>
    %66 = tpu.bitcast %65 : vector<4x256xi32> -> vector<4x256xf32>
    %c0_24 = arith.constant 0 : index
    %c0_25 = arith.constant 0 : index
    %67 = vector.load %arg4[%c0_24, %c0_25] : memref<4x256xf32, #tpu.memory_space<vmem>>, vector<4x256xf32>
    tpu.vector_store %arg4[%c0_24, %c0_25], %66 {strides = array<i32>} : memref<4x256xf32, #tpu.memory_space<vmem>>, vector<4x256xf32>,
    %c0_26 = arith.constant 0 : index
    %c0_27 = arith.constant 0 : index
    %c0_28 = arith.constant 0 : index
    %68 = vector.load %arg6[%c0_26, %c0_27, %c0_28] : memref<1x4x1xf32, #tpu.memory_space<vmem>>, vector<1x4x1xf32>
    %cst_29 = arith.constant dense<0.000000e+00> : vector<4xf32>
    %69 = vector.multi_reduction <add>, %11, %cst_29 [1] : vector<4x256xf32> to vector<4xf32>
    %70 = vector.shape_cast %69 : vector<4xf32> to vector<4x1xf32>
    %71 = vector.shape_cast %70 : vector<4x1xf32> to vector<1x4x1xf32>
    %72 = arith.addf %68, %71 : vector<1x4x1xf32>
    %c0_30 = arith.constant 0 : index
    %c0_31 = arith.constant 0 : index
    %c0_32 = arith.constant 0 : index
    %73 = vector.load %arg6[%c0_30, %c0_31, %c0_32] : memref<1x4x1xf32, #tpu.memory_space<vmem>>, vector<1x4x1xf32>
    tpu.vector_store %arg6[%c0_30, %c0_31, %c0_32], %72 {strides = array<i32>} : memref<1x4x1xf32, #tpu.memory_space<vmem>>, vector<1x4x1xf32>,
    return
  }
  func.func @transform_0(%arg0: i32, %arg1: i32) -> (i32, i32, i32) {
    %c0_i32 = arith.constant 0 : i32
    %c0_i32_0 = arith.constant 0 : i32
    return %arg0, %c0_i32, %arg1 : i32, i32, i32
  }
  func.func @transform_1(%arg0: i32, %arg1: i32) -> (i32, i32, i32) {
    %c0_i32 = arith.constant 0 : i32
    %c0_i32_0 = arith.constant 0 : i32
    return %arg0, %c0_i32, %arg1 : i32, i32, i32
  }
  func.func @transform_2(%arg0: i32, %arg1: i32) -> (i32, i32) {
    %c1_i32 = arith.constant 1 : i32
    %0 = arith.muli %arg0, %c1_i32 : i32
    %1 = arith.addi %0, %arg1 : i32
    %c0_i32 = arith.constant 0 : i32
    %c0_i32_0 = arith.constant 0 : i32
    return %c0_i32, %1 : i32, i32
  }
  func.func @transform_3(%arg0: i32, %arg1: i32) -> (i32, i32, i32) {
    %c0_i32 = arith.constant 0 : i32
    %c0_i32_0 = arith.constant 0 : i32
    %c0_i32_1 = arith.constant 0 : i32
    return %arg0, %c0_i32, %c0_i32_0 : i32, i32, i32
  }
  func.func @transform_4(%arg0: i32, %arg1: i32) -> (i32, i32, i32) {
    %c0_i32 = arith.constant 0 : i32
    %c0_i32_0 = arith.constant 0 : i32
    %c0_i32_1 = arith.constant 0 : i32
    return %arg0, %c0_i32, %c0_i32_0 : i32, i32, i32
  }
}

</mosaic_0001>

<bundles_post_ra>
// kernel: tpu_custom_call.1
= control target key start
LH: loop header
LB: loop body
LE: loop exit
PB: predicated region body
PF: predicated region fallthrough
CT: control target
= control target key end

     0   :  { %10 = vsyncpa [#allocation3], 0  ;;  %s1181_s0 = inlined_call_operand.hbm [shape: f32[2,4,256], index: 0, kind: input, shape index: {}]   ;;  %s1182_s1 = inlined_call_operand.hbm [shape: s32[2,1,256], index: 1, kind: input, shape index: {}]   ;;  %s1183_s2 = inlined_call_operand.hbm [shape: f32[4,512], index: 2, kind: output, shape index: {0}]   ;;  %s1184_s3 = inlined_call_operand.vmem [shape: f32[2,1,1], index: 3, kind: output, shape index: {1}]   ;;  %s1185_s4 = inlined_call_operand.vmem [shape: f32[2,4,1], index: 4, kind: output, shape index: {2}]  }
   0x1   :  { %12 = vsyncpa [#allocation3 + $0x1], 0 }
   0x2   :  { %13 = vsyncpa [#allocation6], 0 }
   0x3   :  { %15 = vsyncpa [#allocation6 + $0x1], 0 }
   0x4   :  { %16 = vsyncpa [#allocation4], 0 }
   0x5   :  { %18 = vsyncpa [#allocation4 + $0x1], 0  ;;  %s916_s15 = smov 0   ;;  %s918_s16 = smov 0  }
   0x6   :  { %s920_s17 = smov 0   ;;  %s922_s18 = smov 0  }
   0x7   :  { %s924_s19 = smov 0   ;;  %s926_s20 = smov 0  }
   0x8 LB: > { %s627_s21 = sadd.s32 4294967295, %s883_s20   ;;  %s628_s22 = sadd.s32 4294967294, %s883_s20   ;;  %s883_s20 = sphi %s926_s20, %s24_s20   ;;  %s879_s19 = sphi %s924_s19, %s1205_s19   ;;  %s875_s18 = sphi %s922_s18, %s1204_s18   ;;  %s871_s17 = sphi %s920_s17, %s1203_s17   ;;  %s867_s16 = sphi %s918_s16, %s1202_s16   ;;  %s863_s15 = sphi %s916_s15, %s1201_s15  }
   0x9   : > { %s36_s23 = sadd.s32 1, %s879_s19  ;;  %s45_s24 = sadd.s32 1, %s871_s17 }
   0xa   : > { %p38_p0 = scmp.ge.s32.totalorder %s36_s23, 2  ;;  %p52_p1 = scmp.ne.s32.totalorder %s871_s17, %s867_s16 }
   0xb   : > { %p53_p2 = scmp.eq.s32.totalorder %s883_s20, 0  ;;  %p58_p3 = scmp.ne.s32.totalorder %s867_s16, %s863_s15 }
   0xc   : > { %s1207_s23 = smov (%p38_p0, %s36_s23), 0  ;;  %p59_p5 = scmp.eq.s32.totalorder %s627_s21, 0 }
   0xd   : > { %p957_p4 = por %p53_p2, %p52_p1  ;;  %s40_s26 = ssub.s32 %s879_s19, %s1207_s23 }
   0xe   : > { %p112_p6 = scmp.eq.s32.totalorder %s627_s21, 1  ;;  %p43_p7 = scmp.eq.s32.totalorder %s40_s26, 0 }
   0xf   : > { %p963_p8 = por %p59_p5, %p58_p3  ;;  %p118_p10 = scmp.eq.s32.totalorder %s628_s22, 1 }
  0x10   : > { %p967_p9 = por %p112_p6, %p52_p1  ;;  %p671_p13 = scmp.lt.s32.totalorder %s883_s20, 2 }
  0x11   : > { %s1189_s27 = scalar_select %p963_p8, 1, 0 }
  0x12   : > { %s1190_s28 = scalar_select %p967_p9, 1, 0 }
  0x13   : > { %s972_s29 = scalar_select %p43_p7, %s871_s17, %s45_s24  }
  0x14   : > { %p974_p11 = por %p118_p10, %p58_p3  ;;  %s981_s5 = sand.u32 1, %s871_s17  }
  0x15   : > { %s631_s6 = sshll.u32 %s981_s5, 3  ;;  %s649_s7 = sshll.u32 %s879_s19, 7 }
  0x16   : > { %s1191_s30 = scalar_select %p974_p11, 1, 0 }
  0x17   : > { %s988_s10 = scalar_lea.hbm %s1181_s0, %s649_s7  ;;  %s194_s11 = scalar_lea.vmem [#allocation2], %s631_s6 }
  0x18   : > { %s204_s12 = sshll.u32 %s194_s11, 4  ;;  %p994_p0 = pnand %p671_p13, %p957_p4  ;;  %s990_s12 = int_to_ptr.vmem [resolvable:$true] %s204_s12 }
  0x19   : > { %s191_s14 = scalar_lea.sflag [#allocation3], %s981_s5  ;;  %s737_s21 = scalar_lea.hbm %s988_s10, 128 }
  0x1a   : > { %p738_p3 = scmp.ne.s32.totalorder %s988_s10, %s737_s21  ;;  %p739_p5 = pneg %p994_p0 }
  0x1b   : > { %s742_s25 = scalar_lea.hbm %s1181_s0, 256  ;;  %p743_p4 = scmp.lt.u32.totalorder %s988_s10, %s1181_s0 }
  0x1c   : > { %p740_p6 = pnand %p739_p5, %p738_p3  ;;  %p744_p10 = scmp.lt.u32.totalorder %s742_s25, %s737_s21 }
  0x1d   : > { %p746_p12 = scmp.lt.u32.totalorder %s737_s21, %s988_s10 }
  0x1e   : > { %p741_p7 = pneg %p740_p6  ;;  %p745_p13 = por %p744_p10, %p743_p4 }
  0x20   : > { %p747_p1 = por %p746_p12, %p745_p13 }
  0x22   : > { %p748_p2 = pnand %p747_p1, %p741_p7 }
  0x24   : > { %751 = shalt.err (!%p748_p2)
}
  0x25   : > { %s752_s7 = scalar_lea.vmem %s990_s12, 128  ;;  %s885_s8 = smov [#allocation2]  }
  0x26   : > { %p753_p3 = scmp.ne.s32.totalorder %s990_s12, %s752_s7  ;;  %s757_s9 = sshll.u32 %s885_s8, 4  ;;  %s758_s9 = int_to_ptr.vmem [resolvable:$false] %s757_s9 }
  0x27   : > { %s759_s11 = scalar_lea.vmem %s758_s9, 256  ;;  %p760_p9 = scmp.lt.s32.totalorder %s990_s12, %s758_s9 }
  0x28   : > { %p755_p6 = pnand %p753_p3, %p739_p5  ;;  %p761_p4 = scmp.lt.s32.totalorder %s759_s11, %s752_s7 }
  0x2a   : > { %p756_p11 = pneg %p755_p6  ;;  %p762_p10 = por %p761_p4, %p760_p9 }
  0x2c   : > { %p763_p12 = pnand %p762_p10, %p756_p11 }
  0x2e   : > { %766 = shalt.err (!%p763_p12)
}
  0x2f   : > { %663 = dma.hbm_to_vmem [thread:$0]  (!%p994_p0), %s988_s10, 128, %s990_s12, %s191_s14  }
  0x30   : > { %p1193_p1 = scmp.lt.s32.totalorder %s883_s20, 3  ;;  %p1194_p2 = scmp.ge.s32.totalorder %s883_s20, 1 }
  0x31   : > { %s634_s22 = sshll.u32 %s981_s5, 1  ;;  %s650_s24 = sshll.u32 %s879_s19, 5 }
  0x32   : > { %p1030_p7 = pnand %p1194_p2, %p1193_p1  ;;  %s1039_s6 = scalar_lea.hbm %s1182_s1, %s650_s24 }
  0x33   : > { %s215_s7 = scalar_lea.vmem [#allocation5], %s634_s22  ;;  %s212_s10 = scalar_lea.sflag [#allocation6], %s981_s5 }
  0x34   : > { %s1195_s21 = scalar_select %p1030_p7, 1, 0 }
  0x35   : > { %s225_s8 = sshll.u32 %s215_s7, 4  ;;  %s767_s12 = scalar_lea.hbm %s1039_s6, 32  ;;  %s226_s8 = int_to_ptr.vmem [resolvable:$true] %s225_s8 }
  0x36   : > { %p768_p9 = scmp.ne.s32.totalorder %s1039_s6, %s767_s12  ;;  %s772_s11 = scalar_lea.hbm %s1182_s1, 64 }
  0x37   : > { %p773_p3 = scmp.lt.u32.totalorder %s1039_s6, %s1182_s1  ;;  %p774_p6 = scmp.lt.u32.totalorder %s772_s11, %s767_s12 }
  0x38   : > { %p770_p11 = pnand %p768_p9, %p739_p5  ;;  %p776_p10 = scmp.lt.u32.totalorder %s767_s12, %s1039_s6 }
  0x39   : > { %p775_p4 = por %p774_p6, %p773_p3 }
  0x3a   : > { %p771_p13 = pneg %p770_p11 }
  0x3b   : > { %p777_p12 = por %p776_p10, %p775_p4 }
  0x3d   : > { %p778_p1 = pnand %p777_p12, %p771_p13 }
  0x3f   : > { %781 = shalt.err (!%p778_p1)
}
  0x40   : > { %s782_s5 = scalar_lea.vmem %s226_s8, 32  ;;  %s886_s22 = smov [#allocation5]  }
  0x41   : > { %p783_p2 = scmp.ne.s32.totalorder %s226_s8, %s782_s5  ;;  %s787_s26 = sshll.u32 %s886_s22, 4  ;;  %s788_s26 = int_to_ptr.vmem [resolvable:$false] %s787_s26 }
  0x42   : > { %s789_s7 = scalar_lea.vmem %s788_s26, 64  ;;  %p790_p8 = scmp.lt.s32.totalorder %s226_s8, %s788_s26 }
  0x43   : > { %p785_p9 = pnand %p783_p2, %p739_p5  ;;  %p791_p7 = scmp.lt.s32.totalorder %s789_s7, %s782_s5 }
  0x45   : > { %p786_p11 = pneg %p785_p9  ;;  %p792_p3 = por %p791_p7, %p790_p8 }
  0x47   : > { %p793_p6 = pnand %p792_p3, %p786_p11 }
  0x49   : > { %796 = shalt.err (!%p793_p6)
}
  0x4a   : > { %666 = dma.hbm_to_vmem [thread:$0]  (!%p994_p0), %s1039_s6, 32, %s226_s8, %s212_s10  }
  0x4b   : > { %p1196_p13 = scmp.ne.s32.totalorder %s1195_s21, 0 }
  0x4c   : > { %s1064_s12 = sand.u32 (!%p1196_p13), 1, %s867_s16   ;;  %p1197_p8 = scmp.ne.s32.totalorder (!%p1196_p13), %s1189_s27, 0 }
  0x4d   : > { %234 = sbr.rel (%p1196_p13) target bundleno = 341 (0x155), region = 28  ;;  %s638_s14 = sshll.u32 (!%p1196_p13), %s1064_s12, 3 }
  0x4e   : > { %s237_s9 = scalar_lea.sflag (!%p1196_p13), [#allocation3], %s1064_s12  ;;  %s240_s11 = scalar_lea.vmem (!%p1196_p13), [#allocation2], %s638_s14 }
  0x54   : > { %850 = dma.done.wait (%p1197_p8), %s237_s9, 128  }
  0x55   : > { %852 = vsyncadd (%p1197_p8), %s237_s9, 4294967168  ;;  %s639_s13 = sshll.u32 %s1064_s12, 1  ;;  %s246_s21 = scalar_lea.sflag [#allocation6], %s1064_s12 }
  0x56   : > { %s249_s6 = scalar_lea.vmem [#allocation5], %s639_s13 }
  0x57   : > { %854 = dma.done.wait (%p1197_p8), %s246_s21, 32  }
  0x58   : > { %856 = vsyncadd (%p1197_p8), %s246_s21, 4294967264  ;;  %v307_v0 = vlaneseq  ;;  %v305_v2 = vld [vmem:[%s240_s11] sm:$0xff]  ;;  %vm353_vm0 = vcmask 1043456   ;;  %v306_v8 = vld [vmem:[%s249_s6] sm:$0x3]  ;;  %v887_v20 = vmov 0  }
  0x59   : > { %v323_v3 = vand.u32 2147483647, %v305_v2  ;;  %v371_v6 = vcombine.high %v305_v2, %v305_v2  ;;  %v373_v7 = vsel %vm353_vm0, %v305_v2, -inf  ;;  %v888_v28 = vmov 0.0   ;;  %p290_p0 = scmp.lt.s32.totalorder %s875_s18, 1  ;;  %s651_s7 = sshll.u32 %s875_s18, 7 }
  0x5a   : > { %v308_v1 = vshrl.u32 %v307_v0, 7  ;;  %v374_v10 = vrot.slane %v373_v7, 4  ;;  %vm338_vm3 = vcmp.ge.f32.partialorder %v305_v2, 0.0  ;;  %v327_v36 = vmax.f32 %v305_v2, 0.0  ;;  %s274_s9 = scalar_lea.vmem [#allocation7], %s638_s14  ;;  %s1132_s6 = scalar_lea.hbm %s1183_s2, %s651_s7 }
  0x5b   : > { %v324_v9 = vsub.f32 0.0, %v323_v3  ;;  %v380_v14 = vsel %vm353_vm0, %v371_v6, -inf  ;;  %vm889_vm6 = vmmov 1   ;;  %s291_s27 = scalar_select %p290_p0, %s875_s18, 1  ;;  %vm301_vm8 = vcmask 0  }
  0x5c   : > { %v311_v4 = vsub.s32 0, %v308_v1  ;;  %v315_v5 = vsub.s32 1, %v308_v1  ;;  %v375_v15 = vmax.f32 %v373_v7, %v374_v10  ;;  %v381_v16 = vrot.slane %v380_v14, 4  ;;  %s470_s11 = sshll.u32 %s274_s9, 4  ;;  %p1198_p7 = scmp.ne.s32.totalorder %s1190_s28, 0  ;;  %s471_s11 = int_to_ptr.vmem [resolvable:$true] %s470_s11 }
  0x5d   : > { %v325_v11 = vmul.f32 1.442695, %v324_v9  ;;  %s1109_s24 = scalar_lea.vmem %s1184_s3, %s291_s27  ;;  %s641_s25 = sshll.u32 %s291_s27, 2  ;;  %vm303_vm9 = vcmask 3072  }
  0x5e   : > { %v312_v12 = vrot.slane %v306_v8, %v311_v4  ;;  %v316_v13 = vrot.slane %v306_v8, %v315_v5  ;;  %v382_v17 = vmax.f32 %v380_v14, %v381_v16  ;;  %v376_v18 = vrot.slane %v375_v15, 2  ;;  %302 = vst.msk [vmem:[%s1109_s24] sm:$0x1] %vm301_vm8, %v888_v28  ;;  %s1119_s26 = scalar_lea.vmem %s1185_s4, %s641_s25  ;;  %s448_s27 = scalar_lea.sflag [#allocation4], %s1064_s12 }
  0x5f   : > { %725 = vpow2.f32 %v325_v11  ;;  %304 = vst.msk [vmem:[%s1119_s26] sm:$0xf] %vm303_vm9, %v888_v28  ;;  %s797_s8 = scalar_lea.vmem %s471_s11, 128  ;;  %s890_s10 = smov [#allocation7]  }
  0x60   : > { %vm317_vm1 = vcmp.eq.s32.totalorder %v312_v12, %v308_v1  ;;  %vm318_vm2 = vcmp.eq.s32.totalorder %v316_v13, %v308_v1  ;;  %v383_v19 = vrot.slane %v382_v17, 2  ;;  %v377_v24 = vmax.f32 %v375_v15, %v376_v18  ;;  %p798_p5 = scmp.ne.s32.totalorder %s471_s11, %s797_s8  ;;  %s801_s25 = sshll.u32 %s890_s10, 4  ;;  %s802_s25 = int_to_ptr.vmem [resolvable:$false] %s801_s25 }
  0x61   : > { %v1082_v21 = vsel %vm317_vm1, 1, %v887_v20  ;;  %v1084_v22 = vsel %vm318_vm2, 1, %v887_v20  ;;  %v1089_v29 = vsel %vm317_vm1, 1.0, %v888_v28  ;;  %v1092_v30 = vsel %vm318_vm2, 1.0, %v888_v28  ;;  %s803_s18 = scalar_lea.vmem %s802_s25, 256  ;;  %p804_p12 = scmp.lt.s32.totalorder %s471_s11, %s802_s25 }
  0x62   : > { %v339_v23 = vcombine.low %v1082_v21, %v1084_v22  ;;  %v384_v25 = vmax.f32 %v382_v17, %v383_v19  ;;  %v378_v31 = vrot.slane %v377_v24, 1  ;;  %v330_v33 = vcombine.low %v1089_v29, %v1092_v30  ;;  %p799_p4 = pnand %p798_p5, %p1198_p7  ;;  %p805_p1 = scmp.lt.s32.totalorder %s803_s18, %s797_s8 }
  0x63   : > { %v439_v54 = vsel %vm353_vm0, %v1089_v29, 0.0  ;;  %v440_v55 = vsel %vm353_vm0, %v1092_v30, 0.0 }
  0x64   : > { %vm340_vm4 = vcmp.ne.s32.totalorder %v339_v23, 0  ;;  %v385_v32 = vrot.slane %v384_v25, 1  ;;  %v379_v34 = vmax.f32 %v377_v24, %v378_v31  ;;  %v332_v37 = vmul.f32 %v330_v33, %v305_v2  ;;  %p800_p10 = pneg %p799_p4  ;;  %p806_p2 = por %p805_p1, %p804_p12 }
  0x65   : > { %vm341_vm5 = vmxor %vm338_vm3, %vm340_vm4  ;;  %v441_v57 = vadd.f32 %v440_v55, %v439_v54 }
  0x66   : > { %v386_v35 = vmax.f32 %v384_v25, %v385_v32  ;;  %vm342_vm7 = vmxor %vm341_vm5, %vm889_vm6  ;;  %v333_v41 = vsub.f32 %v327_v36, %v332_v37  ;;  %p807_p9 = pnand %p806_p2, %p800_p10 }
  0x68   : > { %v389_v38 = vcombine.low %v379_v34, %v386_v35 }
  0x69   : > { %v726_v26 = vpop.eup %725 }
  0x6a   : > { %v334_v27 = vadd.f32 1.0, %v726_v26  ;;  %v343_v39 = vsel %vm342_vm7, 1.0, %v726_v26  ;;  %v391_v45 = vsub.f32 %v305_v2, %v389_v38 }
  0x6c   : > { %727 = vlog2.f32 %v334_v27  ;;  %v392_v49 = vmul.f32 1.442695, %v391_v45 }
  0x6d   : > { %729 = vrcp.f32 %v334_v27 }
  0x6e   : > { %731 = vpow2.f32 %v392_v49 }
  0x76   : > { %v728_v40 = vpop.eup %727 }
  0x77   : > { %v730_v42 = vpop.eup %729  ;;  %v336_v43 = vmul.f32 0.6931472, %v728_v40 }
  0x78   : > { %v345_v44 = vmul.f32 %v730_v42, %v343_v39  ;;  %v732_v58 = vpop.eup %731 }
  0x79   : > { %v337_v46 = vadd.f32 %v336_v43, %v333_v41  ;;  %v395_v59 = vcombine.high %v732_v58, %v732_v58  ;;  %v397_v60 = vsel %vm353_vm0, %v732_v58, 0.0 }
  0x7a   : > { %v346_v47 = vsub.f32 1.0, %v345_v44  ;;  %v398_v62 = vrot.slane %v397_v60, 4 }
  0x7b   : > { %v404_v61 = vsel %vm353_vm0, %v395_v59, 0.0 }
  0x7c   : > { %v347_v48 = vmul.f32 %v346_v47, %v346_v47  ;;  %v405_v63 = vrot.slane %v404_v61, 4  ;;  %v399_v0 = vadd.f32 %v398_v62, %v397_v60 }
  0x7e   : > { %v348_v50 = vmul.f32 %v347_v48, %v337_v46  ;;  %v406_v1 = vadd.f32 %v405_v63, %v404_v61  ;;  %v400_v2 = vrot.slane %v399_v0, 2 }
  0x80   : > { %v351_v51 = vcombine.high %v348_v50, %v348_v50  ;;  %v354_v52 = vsel %vm353_vm0, %v348_v50, 0.0  ;;  %v407_v3 = vrot.slane %v406_v1, 2  ;;  %v401_v4 = vadd.f32 %v400_v2, %v399_v0 }
  0x82   : > { %v355_v53 = vsel %vm353_vm0, %v351_v51, 0.0  ;;  %v408_v5 = vadd.f32 %v407_v3, %v406_v1  ;;  %v402_v6 = vrot.slane %v401_v4, 1 }
  0x83   : > { %v356_v56 = vadd.f32 %v355_v53, %v354_v52 }
  0x84   : > { %v409_v7 = vrot.slane %v408_v5, 1  ;;  %v403_v8 = vadd.f32 %v402_v6, %v401_v4 }
  0x85   : > { %357 = vadd.xlane.f32.xlu0 %v356_v56 }
  0x86   : > { %v410_v9 = vadd.f32 %v409_v7, %v408_v5  ;;  %733 = vrcp.f32 %v403_v8 }
  0x88   : > { %735 = vrcp.f32 %v410_v9 }
  0x89   : > { %442 = vadd.xlane.f32.xlu0 %v441_v57 }
  0x90   : > { %v734_v10 = vpop.eup %733 }
  0x92   : > { %v736_v11 = vpop.eup %735 }
  0x93   : > { %v417_v12 = vcombine.low %v734_v10, %v736_v11 }
  0x95   : > { %v419_v13 = vmul.f32 %v732_v58, %v417_v12 }
  0x97   : > { %v421_v14 = vcombine.high %v419_v13, %v419_v13  ;;  %v423_v15 = vsub.f32 %v1089_v29, %v419_v13 }
  0x99   : > { %v424_v16 = vsub.f32 %v1092_v30, %v421_v14  ;;  %v425_v17 = vand.u32 2147483647, %v423_v15 }
  0x9b   : > { %v426_v18 = vand.u32 2147483647, %v424_v16  ;;  %v427_v19 = vsub.f32 0.0, %v425_v17 }
  0x9d   : > { %v428_v20 = vsub.f32 0.0, %v426_v18  ;;  %v431_v23 = vand.u32 4294967294, %v427_v19 }
  0x9f   : > { %v432_v24 = vand.u32 4294967294, %v428_v20  ;;  %v433_v25 = vor.u32 %v431_v23, %v1082_v21 }
  0xa1   : > { %v434_v26 = vor.u32 %v432_v24, %v1084_v22 }
  0xa3   : > { %v435_v27 = vcombine.low %v433_v25, %v434_v26 }
  0xa5   : > { %437 = vst [vmem:[%s274_s9] sm:$0xff] %v435_v27 }
  0xa6   : > { %810 = shalt.err (!%p807_p9)
}
  0xa7   : > { %s811_s12 = scalar_lea.hbm %s1132_s6, 128  ;;  %s815_s22 = scalar_lea.hbm %s1183_s2, 256 }
  0xa8   : > { %p812_p11 = scmp.ne.s32.totalorder %s1132_s6, %s811_s12  ;;  %p816_p13 = scmp.lt.u32.totalorder %s1132_s6, %s1183_s2 }
  0xa9   : > { %p817_p8 = scmp.lt.u32.totalorder %s815_s22, %s811_s12  ;;  %p819_p5 = scmp.lt.u32.totalorder %s811_s12, %s1132_s6 }
  0xaa   : > { %p813_p3 = pnand %p812_p11, %p1198_p7 }
  0xab   : > { %p818_p0 = por %p817_p8, %p816_p13 }
  0xac   : > { %p814_p6 = pneg %p813_p3 }
  0xad   : > { %p820_p4 = por %p819_p5, %p818_p0 }
  0xaf   : > { %p821_p10 = pnand %p820_p4, %p814_p6 }
  0xb1   : > { %824 = shalt.err (!%p821_p10)
}
  0xb2   : > { %658 = dma.vmem_to_hbm [thread:$0]  (%p1198_p7), %s471_s11, 128, %s1132_s6, %s448_s27   ;;  %v438_v28 = vld [vmem:[%s1119_s26] sm:$0xf] }
  0xb3   : > { %v349_v36 = vld [vmem:[%s1109_s24] sm:$0x1] }
 0x112   : > { %v358_v21 = vpop.xlane.xlu0 %357 }
 0x113   : > { %v359_v22 = vrot.slane %v358_v21, 4 }
 0x115   : > { %v360_v29 = vadd.f32 %v359_v22, %v358_v21 }
 0x116   : > { %v443_v30 = vpop.xlane.xlu0 %442 }
 0x117   : > { %v361_v31 = vrot.slane %v360_v29, 2  ;;  %v444_v32 = vadd.f32 %v443_v30, %v438_v28 }
 0x119   : > { %v362_v33 = vadd.f32 %v361_v31, %v360_v29  ;;  %446 = vst.msk [vmem:[%s1119_s26] sm:$0xf] %vm303_vm9, %v444_v32 }
 0x11b   : > { %v363_v34 = vrot.slane %v362_v33, 1 }
 0x11d   : > { %v364_v35 = vadd.f32 %v363_v34, %v362_v33 }
 0x11f   : > { %652 = vpush %v364_v35 }
 0x150   : > { %s653_s28 = spop %652 }
 0x151   : > { %v366_v37 = vstv %s653_s28 }
 0x152   : > { %v367_v38 = vadd.f32 %v366_v37, %v349_v36 }
 0x154   : > { %369 = vst.msk [vmem:[%s1109_s24] sm:$0x1] %vm301_vm8, %v367_v38 }
 0x155 PF: > { %s488_s11 = sand.u32 1, %s863_s15   ;;  %p1199_p7 = scmp.ne.s32.totalorder %s1191_s30, 0 }
 0x156   : > { %p1200_p12 = scmp.ge.s32.totalorder %s883_s20, 2  ;;  %s489_s13 = scalar_lea.sflag [#allocation4], %s488_s11 }
 0x158   : > { %p668_p1 = pnand %p1200_p12, %p1199_p7 }
 0x15a   : > { %858 = dma.done.wait (!%p668_p1), %s489_s13, 128  }
 0x15b   : > { %860 = vsyncadd (!%p668_p1), %s489_s13, 4294967168  ;;  %s24_s20 = sadd.s32 1, %s883_s20   ;;  %s1201_s15 = smov %s867_s16 }
 0x15c   : > { %p21_p2 = scmp.ge.s32.totalorder %s24_s20, 4   ;;  %s1202_s16 = smov %s871_s17 }
 0x15d   : > { %s1203_s17 = smov %s972_s29  ;;  %s1204_s18 = smov %s879_s19 }
 0x15e   : > { %s1205_s19 = smov %s1207_s23  ;;  %23 = sbr.rel (!%p21_p2) target bundleno = 8 (0x8), region = 114 }
 0x165   :  { %507 = vsyncpa [#allocation3], 1 }
 0x166   :  { %509 = vsyncpa [#allocation3 + $0x1], 1 }
 0x167   :  { %510 = vsyncpa [#allocation6], 1 }
 0x168   :  { %512 = vsyncpa [#allocation6 + $0x1], 1 }
 0x169   :  { %513 = vsyncpa [#allocation4], 1 }
 0x16a   :  { %515 = vsyncpa [#allocation4 + $0x1], 1 }

</bundles_post_ra>
